<compile_context>
chip_gen: v6e
topology: v6e:2x2x1
jax: 0.10.0
libtpu: 0.0.40
codegen_flags: <defaults>
</compile_context>

<pallas_src>
import jax
import jax.numpy as jnp
from jax.experimental import pallas as pl
from jax.experimental.pallas import tpu as pltpu

NUM_MUS = 5
ACTION_DIM = NUM_MUS          # 5
STATE_DIM = 2 * NUM_MUS       # 10
HIDDEN = 64


def generator_mlp_kernel(x_ref, w1_ref, b1_ref, w2_ref, b2_ref,
                         w3_ref, b3_ref, o_ref):
    # x_ref: (STATE_DIM, tb)  -- batch on lanes
    x = x_ref[...]
    # fc1 + relu: (HIDDEN, STATE_DIM) @ (STATE_DIM, tb) -> (HIDDEN, tb)
    h1 = jnp.dot(w1_ref[...], x, preferred_element_type=jnp.float32)
    h1 = jnp.maximum(h1 + b1_ref[...], 0.0)           # b1: (HIDDEN, 1) lane-broadcast
    # fc2 + relu: (HIDDEN, HIDDEN) @ (HIDDEN, tb) -> (HIDDEN, tb)
    h2 = jnp.dot(w2_ref[...], h1.astype(w2_ref.dtype),
                 preferred_element_type=jnp.float32)
    h2 = jnp.maximum(h2 + b2_ref[...], 0.0)
    # fc3 (no activation): (ACTION_DIM, HIDDEN) @ (HIDDEN, tb) -> (ACTION_DIM, tb)
    out = jnp.dot(w3_ref[...], h2.astype(w3_ref.dtype),
                  preferred_element_type=jnp.float32)
    o_ref[...] = (out + b3_ref[...]).astype(o_ref.dtype)


def _choose_batch_tile(B):
    """Lane-aligned batch tile.  Small B: one full-extent block (last dim ==
    array dim, so no 128 constraint).  Large B: multiple of 128, capped at
    4096 (per-step tiles ~1 MiB << 32 MiB scoped VMEM on v7x) and sized so
    grid >= 2 (dual-TC sharding on v7x via the "parallel" axis)."""
    if B <= 256:
        return B
    tb = min(4096, (B // 2 // 128) * 128)
    return max(tb, 128)


def generator_forward_t(state_t, params, *, batch_tile=None,
                        out_dtype=jnp.float32, x_buffers=2):
    """Feature-major throughput path: state_t [STATE_DIM, B] -> [ACTION_DIM, B]."""
    w1, b1, w2, b2, w3, b3 = params
    B = state_t.shape[1]
    tb = _choose_batch_tile(B) if batch_tile is None else batch_tile
    tb = min(tb, B)                                   # guard batch_tile > B
    grid = (pl.cdiv(B, tb),)

    full = lambda i: (0, 0)
    if x_buffers != 2:
        # Optional deeper input pipelining if profiling shows exposed x DMA.
        x_spec = pl.BlockSpec((STATE_DIM, tb), lambda i: (0, i),
                              pipeline_mode=pl.Buffered(x_buffers))
    else:
        x_spec = pl.BlockSpec((STATE_DIM, tb), lambda i: (0, i))

    # Advisory cost hint for XLA scheduling around the custom call.
    flops = 2 * B * (STATE_DIM * HIDDEN + HIDDEN * HIDDEN + HIDDEN * ACTION_DIM)
    param_bytes = sum(int(a.size) * a.dtype.itemsize
                      for a in (w1, b1, w2, b2, w3, b3))
    bytes_accessed = (int(state_t.size) * state_t.dtype.itemsize
                      + B * ACTION_DIM * jnp.dtype(out_dtype).itemsize
                      + param_bytes)

    return pl.pallas_call(
        generator_mlp_kernel,
        out_shape=jax.ShapeDtypeStruct((ACTION_DIM, B), out_dtype),
        grid_spec=pltpu.PrefetchScalarGridSpec(
            num_scalar_prefetch=0,
            grid=grid,
            in_specs=[
                x_spec,                                          # x^T tile
                pl.BlockSpec((HIDDEN, STATE_DIM), full),         # w1 [out, in]
                pl.BlockSpec((HIDDEN, 1), full),                 # b1
                pl.BlockSpec((HIDDEN, HIDDEN), full),            # w2
                pl.BlockSpec((HIDDEN, 1), full),                 # b2
                pl.BlockSpec((ACTION_DIM, HIDDEN), full),        # w3
                pl.BlockSpec((ACTION_DIM, 1), full),             # b3
            ],
            out_specs=pl.BlockSpec((ACTION_DIM, tb), lambda i: (0, i)),
        ),
        compiler_params=pltpu.CompilerParams(
            dimension_semantics=("parallel",)),
        cost_estimate=pl.CostEstimate(
            flops=flops, transcendentals=0, bytes_accessed=bytes_accessed),
    )(state_t, w1, b1, w2, b2, w3, b3)


def generator_forward(state, params, **kwargs):
    """Drop-in PyTorch semantics: state [B, STATE_DIM] -> [B, ACTION_DIM].
    Transposes (tiny: 40 B/row in, 20 B/row out) wrap the feature-major core;
    call generator_forward_t directly if your data is already feature-major."""
    return generator_forward_t(state.T, params, **kwargs).T


def init_params(key):
    """PyTorch nn.Linear default init; weights kept in PyTorch [out, in] layout,
    biases as [out, 1] (feature-major broadcast)."""
    def linear(k, fan_in, fan_out):
        kw, kb = jax.random.split(k)
        bound = 1.0 / jnp.sqrt(fan_in)
        w = jax.random.uniform(kw, (fan_out, fan_in), jnp.float32, -bound, bound)
        b = jax.random.uniform(kb, (fan_out, 1), jnp.float32, -bound, bound)
        return w, b

    k1, k2, k3 = jax.random.split(key, 3)
    w1, b1 = linear(k1, STATE_DIM, HIDDEN)
    w2, b2 = linear(k2, HIDDEN, HIDDEN)
    w3, b3 = linear(k3, HIDDEN, ACTION_DIM)
    return (w1, b1, w2, b2, w3, b3)


def reference_forward(state, params):
    """Pure-JAX reference in PyTorch batch-major convention."""
    w1, b1, w2, b2, w3, b3 = params
    h1 = jnp.maximum(state @ w1.T + b1.T, 0.0)
    h2 = jnp.maximum(h1 @ w2.T + b2.T, 0.0)
    return h2 @ w3.T + b3.T


if __name__ == "__main__":
    key = jax.random.PRNGKey(0)
    kp, kx = jax.random.split(key)
    params = init_params(kp)

    # Small but multi-tile: B=256 with batch_tile=128 -> grid=(2,), exercising
    # pipelining / dual-TC sharding while staying tiny.
    B = 256
    state = jax.random.normal(kx, (B, STATE_DIM), jnp.float32)

    out = jax.block_until_ready(generator_forward(state, params, batch_tile=128))
    ref = reference_forward(state, params)
    assert out.shape == (B, ACTION_DIM), out.shape
    assert jnp.allclose(out, ref, atol=1e-5, rtol=1e-5), "mismatch vs reference"

    # Default tile-selection path with a batch smaller than one tile.
    out_small = jax.block_until_ready(generator_forward(state[:8], params))
    assert out_small.shape == (8, ACTION_DIM), out_small.shape
    assert jnp.allclose(out_small, ref[:8], atol=1e-5, rtol=1e-5), "small-batch mismatch"

    print("KERNEL_OK")
</pallas_src>

<mosaic_0001>
module attributes {stable_mosaic.version = 11 : i64} {
  func.func @generator_mlp_kernel(%arg0: i32, %arg1: memref<10x128xf32, #tpu.memory_space<vmem>>, %arg2: memref<64x10xf32, #tpu.memory_space<vmem>>, %arg3: memref<64x1xf32, #tpu.memory_space<vmem>>, %arg4: memref<64x64xf32, #tpu.memory_space<vmem>>, %arg5: memref<64x1xf32, #tpu.memory_space<vmem>>, %arg6: memref<5x64xf32, #tpu.memory_space<vmem>>, %arg7: memref<5x1xf32, #tpu.memory_space<vmem>>, %arg8: memref<5x128xf32, #tpu.memory_space<vmem>>) attributes {dimension_semantics = [#tpu.dimension_semantics<parallel>], iteration_bounds = array<i64: 2>, scalar_prefetch = 0 : i64, scratch_operands = 0 : i64, tpu.core_type = #tpu.core_type<tc>, window_params = [{transform_indices = @transform_0, window_bounds = array<i64: 10, 128>}, {pipeline_mode = #tpu.pipeline_mode<synchronous>, transform_indices = @transform_1, window_bounds = array<i64: 64, 10>}, {pipeline_mode = #tpu.pipeline_mode<synchronous>, transform_indices = @transform_2, window_bounds = array<i64: 64, 1>}, {pipeline_mode = #tpu.pipeline_mode<synchronous>, transform_indices = @transform_3, window_bounds = array<i64: 64, 64>}, {pipeline_mode = #tpu.pipeline_mode<synchronous>, transform_indices = @transform_4, window_bounds = array<i64: 64, 1>}, {pipeline_mode = #tpu.pipeline_mode<synchronous>, transform_indices = @transform_5, window_bounds = array<i64: 5, 64>}, {pipeline_mode = #tpu.pipeline_mode<synchronous>, transform_indices = @transform_6, window_bounds = array<i64: 5, 1>}, {transform_indices = @transform_7, window_bounds = array<i64: 5, 128>}]} {
    %c0 = arith.constant 0 : index
    %c0_0 = arith.constant 0 : index
    %0 = vector.load %arg1[%c0, %c0_0] : memref<10x128xf32, #tpu.memory_space<vmem>>, vector<10x128xf32>
    %c0_1 = arith.constant 0 : index
    %c0_2 = arith.constant 0 : index
    %1 = vector.load %arg2[%c0_1, %c0_2] : memref<64x10xf32, #tpu.memory_space<vmem>>, vector<64x10xf32>
    %cst = arith.constant dense<0.000000e+00> : vector<64x128xf32>
    %2 = tpu.matmul %1, %0, %cst {dimension_numbers = #tpu.dot_dimension_numbers<[1], [0], [0], [1], [0, 0, 1, 1], [], []>} : vector<64x10xf32>, vector<10x128xf32>, vector<64x128xf32> -> vector<64x128xf32>
    %c0_3 = arith.constant 0 : index
    %c0_4 = arith.constant 0 : index
    %3 = vector.load %arg3[%c0_3, %c0_4] : memref<64x1xf32, #tpu.memory_space<vmem>>, vector<64x1xf32>
    %4 = vector.broadcast %3 : vector<64x1xf32> to vector<64x128xf32>
    %5 = arith.addf %2, %4 : vector<64x128xf32>
    %cst_5 = arith.constant 0.000000e+00 : f32
    %6 = vector.broadcast %cst_5 : f32 to vector<64x128xf32>
    %7 = arith.maximumf %5, %6 : vector<64x128xf32>
    %c0_6 = arith.constant 0 : index
    %c0_7 = arith.constant 0 : index
    %8 = vector.load %arg4[%c0_6, %c0_7] : memref<64x64xf32, #tpu.memory_space<vmem>>, vector<64x64xf32>
    %cst_8 = arith.constant dense<0.000000e+00> : vector<64x128xf32>
    %9 = tpu.matmul %8, %7, %cst_8 {dimension_numbers = #tpu.dot_dimension_numbers<[1], [0], [0], [1], [0, 0, 1, 1], [], []>} : vector<64x64xf32>, vector<64x128xf32>, vector<64x128xf32> -> vector<64x128xf32>
    %c0_9 = arith.constant 0 : index
    %c0_10 = arith.constant 0 : index
    %10 = vector.load %arg5[%c0_9, %c0_10] : memref<64x1xf32, #tpu.memory_space<vmem>>, vector<64x1xf32>
    %11 = vector.broadcast %10 : vector<64x1xf32> to vector<64x128xf32>
    %12 = arith.addf %9, %11 : vector<64x128xf32>
    %cst_11 = arith.constant 0.000000e+00 : f32
    %13 = vector.broadcast %cst_11 : f32 to vector<64x128xf32>
    %14 = arith.maximumf %12, %13 : vector<64x128xf32>
    %c0_12 = arith.constant 0 : index
    %c0_13 = arith.constant 0 : index
    %15 = vector.load %arg6[%c0_12, %c0_13] : memref<5x64xf32, #tpu.memory_space<vmem>>, vector<5x64xf32>
    %cst_14 = arith.constant dense<0.000000e+00> : vector<5x128xf32>
    %16 = tpu.matmul %15, %14, %cst_14 {dimension_numbers = #tpu.dot_dimension_numbers<[1], [0], [0], [1], [0, 0, 1, 1], [], []>} : vector<5x64xf32>, vector<64x128xf32>, vector<5x128xf32> -> vector<5x128xf32>
    %c0_15 = arith.constant 0 : index
    %c0_16 = arith.constant 0 : index
    %17 = vector.load %arg7[%c0_15, %c0_16] : memref<5x1xf32, #tpu.memory_space<vmem>>, vector<5x1xf32>
    %18 = vector.broadcast %17 : vector<5x1xf32> to vector<5x128xf32>
    %19 = arith.addf %16, %18 : vector<5x128xf32>
    %c0_17 = arith.constant 0 : index
    %c0_18 = arith.constant 0 : index
    %20 = vector.load %arg8[%c0_17, %c0_18] : memref<5x128xf32, #tpu.memory_space<vmem>>, vector<5x128xf32>
    tpu.vector_store %arg8[%c0_17, %c0_18], %19 {strides = array<i32>} : memref<5x128xf32, #tpu.memory_space<vmem>>, vector<5x128xf32>,
    return
  }
  func.func @transform_0(%arg0: i32) -> (i32, i32) {
    %c0_i32 = arith.constant 0 : i32
    %c0_i32_0 = arith.constant 0 : i32
    return %c0_i32, %arg0 : i32, i32
  }
  func.func @transform_1(%arg0: i32) -> (i32, i32) {
    %c0_i32 = arith.constant 0 : i32
    %c0_i32_0 = arith.constant 0 : i32
    %c0_i32_1 = arith.constant 0 : i32
    return %c0_i32, %c0_i32_0 : i32, i32
  }
  func.func @transform_2(%arg0: i32) -> (i32, i32) {
    %c0_i32 = arith.constant 0 : i32
    %c0_i32_0 = arith.constant 0 : i32
    %c0_i32_1 = arith.constant 0 : i32
    return %c0_i32, %c0_i32_0 : i32, i32
  }
  func.func @transform_3(%arg0: i32) -> (i32, i32) {
    %c0_i32 = arith.constant 0 : i32
    %c0_i32_0 = arith.constant 0 : i32
    %c0_i32_1 = arith.constant 0 : i32
    return %c0_i32, %c0_i32_0 : i32, i32
  }
  func.func @transform_4(%arg0: i32) -> (i32, i32) {
    %c0_i32 = arith.constant 0 : i32
    %c0_i32_0 = arith.constant 0 : i32
    %c0_i32_1 = arith.constant 0 : i32
    return %c0_i32, %c0_i32_0 : i32, i32
  }
  func.func @transform_5(%arg0: i32) -> (i32, i32) {
    %c0_i32 = arith.constant 0 : i32
    %c0_i32_0 = arith.constant 0 : i32
    %c0_i32_1 = arith.constant 0 : i32
    return %c0_i32, %c0_i32_0 : i32, i32
  }
  func.func @transform_6(%arg0: i32) -> (i32, i32) {
    %c0_i32 = arith.constant 0 : i32
    %c0_i32_0 = arith.constant 0 : i32
    %c0_i32_1 = arith.constant 0 : i32
    return %c0_i32, %c0_i32_0 : i32, i32
  }
  func.func @transform_7(%arg0: i32) -> (i32, i32) {
    %c0_i32 = arith.constant 0 : i32
    %c0_i32_0 = arith.constant 0 : i32
    return %c0_i32, %arg0 : i32, i32
  }
}

</mosaic_0001>

<bundles_post_ra>
// kernel: tpu_custom_call.1
= control target key start
LH: loop header
LB: loop body
LE: loop exit
PB: predicated region body
PF: predicated region fallthrough
CT: control target
= control target key end

     0   :  { %12 = vsyncpa [#allocation4], 0  ;;  %s1370_s0 = inlined_call_operand.vmem [shape: f32[10,256], index: 0, kind: input, shape index: {}]   ;;  %s1371_s1 = inlined_call_operand.vmem [shape: f32[64,10], index: 1, kind: input, shape index: {}]   ;;  %s1372_s2 = inlined_call_operand.vmem [shape: f32[64,1], index: 2, kind: input, shape index: {}]   ;;  %s1373_s3 = inlined_call_operand.vmem [shape: f32[64,64], index: 3, kind: input, shape index: {}]   ;;  %s1374_s4 = inlined_call_operand.vmem [shape: f32[64,1], index: 4, kind: input, shape index: {}]   ;;  %s1375_s5 = inlined_call_operand.vmem [shape: f32[5,64], index: 5, kind: input, shape index: {}]   ;;  %s1376_s6 = inlined_call_operand.vmem [shape: f32[5,1], index: 6, kind: input, shape index: {}]   ;;  %s1377_s7 = inlined_call_operand.hbm [shape: f32[5,256], index: 7, kind: output, shape index: {}]  }
   0x1   :  { %14 = vsyncpa [#allocation4 + $0x1], 0  ;;  %s1148_s24 = smov 0   ;;  %s1150_s25 = smov 0  }
   0x2   :  { %s1152_s26 = smov 0   ;;  %s1154_s27 = smov 0  }
   0x3 LB: > { %s869_s28 = sadd.s32 4294967295, %s1102_s27   ;;  %s870_s29 = sadd.s32 4294967294, %s1102_s27   ;;  %s1102_s27 = sphi %s1154_s27, %s1383_s27   ;;  %s1098_s26 = sphi %s1152_s26, %s1382_s26   ;;  %s1094_s25 = sphi %s1150_s25, %s1381_s25   ;;  %s1090_s24 = sphi %s1148_s24, %s1380_s24  }
   0x4   : > { %s1171_s30 = sadd.s32 1, %s1102_s27   ;;  %s27_s8 = sadd.s32 1, %s1098_s26 }
   0x5   : > { %s24_s9 = ssub.s32 %s1102_s27, %s1171_s30  ;;  %p34_p0 = scmp.ne.s32.totalorder %s1098_s26, %s1094_s25 }
   0x6   : > { %p25_p1 = scmp.eq.s32.totalorder %s24_s9, 0  ;;  %p35_p2 = scmp.eq.s32.totalorder %s1102_s27, 0 }
   0x7   : > { %p190_p3 = scmp.eq.s32.totalorder %s869_s28, 1  ;;  %p195_p4 = scmp.ne.s32.totalorder %s1094_s25, %s1090_s24 }
   0x8   : > { %s1184_s10 = scalar_select %p25_p1, %s1098_s26, %s27_s8  }
   0x9   : > { %p36_p5 = por %p35_p2, %p34_p0  ;;  %p1186_p6 = por %p190_p3, %p34_p0 }
   0xa   : > { %p196_p7 = scmp.eq.s32.totalorder %s870_s29, 1  ;;  %p872_p9 = scmp.ge.s32.totalorder %s1102_s27, 2 }
   0xc   : > { %p1190_p8 = por %p196_p7, %p195_p4  ;;  %230 = sbr.rel (%p872_p9) target bundleno = 22 (0x16), region = 40 }
  0x11   : > { %233 = sbr.rel (!%p36_p5) target bundleno = 22 (0x16), region = 44  ;;  %s235_s13 = sand.u32 (%p36_p5), 1, %s1098_s26  }
  0x12   : > { %s874_s14 = sshll.u32 (%p36_p5), %s1102_s27, 3  ;;  %s873_s15 = sshll.u32 (%p36_p5), %s235_s13, 4 }
  0x13   : > { %s239_s18 = scalar_lea.vmem (%p36_p5), %s1370_s0, %s874_s14  ;;  %s237_s19 = scalar_lea.vmem (%p36_p5), [#allocation2], %s873_s15 }
  0x14   : > { %v270_v0 = vld [vmem:[%s239_s18] sm:$0xff] (%p36_p5)  ;;  %v272_v1 = vld [vmem:[%s239_s18 + $0x10] sm:$0xff] (%p36_p5) }
  0x15   : > { %271 = vst [vmem:[%s237_s19] sm:$0xff] (%p36_p5), %v270_v0  ;;  %273 = vst [vmem:[%s237_s19 + $0x8] sm:$0xff] (%p36_p5), %v272_v1 }
  0x16 PF: > { %p875_p10 = scmp.ge.s32.totalorder %s1102_s27, 1  ;;  %p278_p11 = scmp.lt.s32.totalorder %s1102_s27, 3 }
  0x18   : > { %p279_p12 = pnand %p875_p10, %p278_p11 }
  0x19   : > { %s1205_s20 = sand.u32 (!%p279_p12), 1, %s1094_s25   ;;  %s897_s13 = sshll.u32 (!%p279_p12), %s869_s28, 7 }
  0x1a   : > { %282 = sbr.rel (%p279_p12) target bundleno = 695 (0x2b7), region = 82  ;;  %s876_s23 = sshll.u32 (!%p279_p12), %s1205_s20, 4 }
  0x1b   : > { %s287_s9 = scalar_lea.vmem (!%p279_p12), [#allocation2], %s876_s23  ;;  %s1333_s18 = scalar_lea.hbm (!%p279_p12), %s1377_s7, %s897_s13 }
  0x1c   : > { %s792_s19 = scalar_lea.sflag (!%p279_p12), [#allocation4], %s1205_s20  ;;  %s1107_s28 = smov (!%p279_p12), [#allocation3]  }
  0x1d   : > { %s1046_s22 = sshll.u32 (!%p279_p12), %s1107_s28, 4  ;;  %s1047_s22 = int_to_ptr.vmem [resolvable:$false] %s1046_s22 }
  0x1e   : > { %s1048_s23 = scalar_lea.vmem (!%p279_p12), %s1047_s22, 256 }
  0x1f   : > { %v318_v2 = vld [vmem:[%s1371_s1] sm:$0xff]  ;;  %vm374_vm0 = vcmask 80896   ;;  %vm399_vm1 = vcmask 1041408   ;;  %v1104_v3 = vmov 0   ;;  %v333_v4 = vld [vmem:[%s1372_s2 + $0x38] sm:$0xff]  ;;  %v332_v7 = vld [vmem:[%s1372_s2 + $0x30] sm:$0xff] }
  0x20   : > { %939 = vmatprep.mubr.msk.f32.mxu0 %vm374_vm0, %v318_v2  ;;  %1040 = vset.pattern.permute.xlu0 %v1104_v3  ;;  %v317_v5 = vld [vmem:[%s287_s9 + $0x8] sm:$0x3]  ;;  %v316_v6 = vld [vmem:[%s287_s9] sm:$0xff]  ;;  %vm572_vm2 = vcmask 523264   ;;  %vm1106_vm3 = vmmov 0   ;;  %s877_s9 = sshll.u32 %s1205_s20, 3 }
  0x21   : > { %1041 = vset.pattern.permute.xlu1 %v1104_v3  ;;  %371 = vperm.xlu0 %1040, %v333_v4   ;;  %v331_v8 = vld [vmem:[%s1372_s2 + $0x28] sm:$0xff]  ;;  %v320_v10 = vld [vmem:[%s1371_s1 + $0x10] sm:$0xff]  ;;  %v330_v11 = vld [vmem:[%s1372_s2 + $0x20] sm:$0xff]  ;;  %s315_s14 = scalar_lea.vmem [#allocation3], %s877_s9 }
  0x22   : > { %935 = vmatprep.subr.msk.mxu0 %vm399_vm1, %v317_v5  ;;  %v319_v9 = vld [vmem:[%s1371_s1 + $0x8] sm:$0xff]  ;;  %361 = vperm.xlu1 %1041, %v331_v8   ;;  %v329_v12 = vld [vmem:[%s1372_s2 + $0x18] sm:$0xff]  ;;  %v322_v14 = vld [vmem:[%s1371_s1 + $0x20] sm:$0xff]  ;;  %s805_s15 = sshll.u32 %s315_s14, 4  ;;  %s806_s15 = int_to_ptr.vmem [resolvable:$true] %s805_s15 }
  0x23   : > { %936 = vmatpush3.msk.msra.mxu0 %vm399_vm1, %v317_v5  ;;  %v321_v13 = vld [vmem:[%s1371_s1 + $0x18] sm:$0xff]  ;;  %v328_v15 = vld [vmem:[%s1372_s2 + $0x10] sm:$0xff]  ;;  %v327_v16 = vld [vmem:[%s1372_s2 + $0x8] sm:$0xff]  ;;  %s1042_s21 = scalar_lea.vmem %s806_s15, 128  ;;  %p1049_p2 = scmp.lt.s32.totalorder %s806_s15, %s1047_s22 }
  0x24   : > { %937 = vmatprep.subr.mxu0 %v316_v6  ;;  %v323_v17 = vld [vmem:[%s1371_s1 + $0x28] sm:$0xff]  ;;  %v324_v18 = vld [vmem:[%s1371_s1 + $0x30] sm:$0xff]  ;;  %v326_v19 = vld [vmem:[%s1372_s2] sm:$0xff]  ;;  %p1043_p13 = scmp.ne.s32.totalorder %s806_s15, %s1042_s21  ;;  %p1050_p3 = scmp.lt.s32.totalorder %s1048_s23, %s1042_s21 }
  0x25   : > { %938 = vmatpush3.msra.mxu0 %v316_v6  ;;  %366 = vperm.xlu0 %1040, %v332_v7   ;;  %v531_v20 = vld [vmem:[%s1374_s4 + $0x38] sm:$0xff]  ;;  %v530_v22 = vld [vmem:[%s1374_s4 + $0x30] sm:$0xff]  ;;  %v529_v23 = vld [vmem:[%s1374_s4 + $0x28] sm:$0xff]  ;;  %v1105_v6 = vmov 0.0  }
  0x26   : > { %940 = vmatmul.mubr.msk.f32.vlgmr.msra.gmra.mxu0 %vm374_vm0, %v319_v9  ;;  %356 = vperm.xlu1 %1041, %v330_v11   ;;  %v325_v21 = vld [vmem:[%s1371_s1 + $0x38] sm:$0xff]  ;;  %v528_v24 = vld [vmem:[%s1374_s4 + $0x20] sm:$0xff]  ;;  %v526_v26 = vld [vmem:[%s1374_s4 + $0x10] sm:$0xff]  ;;  %p1044_p0 = pnand %p1043_p13, %p1186_p6  ;;  %p1051_p4 = por %p1050_p3, %p1049_p2 }
  0x27   : > { %942 = vmatprep.mubr.msk.f32.mxu0 %vm374_vm0, %v320_v10  ;;  %v527_v25 = vld [vmem:[%s1374_s4 + $0x18] sm:$0xff]  ;;  %v525_v27 = vld [vmem:[%s1374_s4 + $0x8] sm:$0xff]  ;;  %v524_v28 = vld [vmem:[%s1374_s4] sm:$0xff]  ;;  %979 = vmatprep.subr.mxu0 %v1105_v6 }
  0x28   : > { %v711_v29 = vld [vmem:[%s1376_s6] sm:$0x1f]  ;;  %v517_v63 = vld [vmem:[%s1373_s3 + $0x8] sm:$0xff]  ;;  %v518_v0 = vld [vmem:[%s1373_s3 + $0x10] sm:$0xff]  ;;  %p1045_p1 = pneg %p1044_p0 }
  0x29   : > { %351 = vperm.xlu0 %1040, %v329_v12   ;;  %v516_v30 = vld [vmem:[%s1373_s3] sm:$0xff]  ;;  %v519_v1 = vld [vmem:[%s1373_s3 + $0x18] sm:$0xff]  ;;  %v521_v3 = vld [vmem:[%s1373_s3 + $0x28] sm:$0xff] }
  0x2a   : > { %943 = vmatmul.mubr.msk.f32.gmra.mxu0 %vm374_vm0, %v321_v13  ;;  %346 = vperm.xlu1 %1041, %v328_v15   ;;  %v520_v2 = vld [vmem:[%s1373_s3 + $0x20] sm:$0xff]  ;;  %v522_v4 = vld [vmem:[%s1373_s3 + $0x30] sm:$0xff]  ;;  %v523_v5 = vld [vmem:[%s1373_s3 + $0x38] sm:$0xff]  ;;  %p1052_p5 = pnand %p1051_p4, %p1045_p1 }
  0x2b   : > { %945 = vmatprep.mubr.msk.f32.mxu0 %vm374_vm0, %v322_v14  ;;  %967 = vmatprep.mubr.msk.f32.mxu1 %vm572_vm2, %v516_v30 }
  0x2d   : > { %341 = vperm.xlu0 %1040, %v327_v16  }
  0x2e   : > { %946 = vmatmul.mubr.msk.f32.gmra.mxu0 %vm374_vm0, %v323_v17  ;;  %336 = vperm.xlu1 %1041, %v326_v19  }
  0x2f   : > { %948 = vmatprep.mubr.msk.f32.mxu0 %vm374_vm0, %v324_v18 }
  0x31   : > { %569 = vperm.xlu0 %1040, %v531_v20  }
  0x32   : > { %949 = vmatmul.mubr.msk.f32.gmra.mxu0 %vm374_vm0, %v325_v21  ;;  %564 = vperm.xlu1 %1041, %v530_v22  }
  0x33   : > { %995 = vmatprep.mubr.msk.f32.mxu0 %vm1106_vm3, %v1105_v6 }
  0x35   : > { %559 = vperm.xlu0 %1040, %v529_v23  }
  0x36   : > { %554 = vperm.xlu1 %1041, %v528_v24  }
  0x39   : > { %549 = vperm.xlu0 %1040, %v527_v25  }
  0x3a   : > { %544 = vperm.xlu1 %1041, %v526_v26  }
  0x3d   : > { %539 = vperm.xlu0 %1040, %v525_v27  }
  0x3e   : > { %534 = vperm.xlu1 %1041, %v524_v28  }
  0x41   : > { %714 = vperm.xlu0 %1040, %v711_v29  }
  0x9c   : > { %v372_v33 = vpop.permute.xlu0 %371 }
  0x9d   : > { %v362_v35 = vpop.permute.xlu1 %361 }
  0xa0   : > { %v367_v38 = vpop.permute.xlu0 %366 }
  0xa1   : > { %v357_v40 = vpop.permute.xlu1 %356 }
  0xa4   : > { %v352_v47 = vpop.permute.xlu0 %351 }
  0xa5   : > { %v347_v50 = vpop.permute.xlu1 %346 }
  0xa8   : > { %v342_v55 = vpop.permute.xlu0 %341 }
  0xa9   : > { %v337_v58 = vpop.permute.xlu1 %336 }
  0xac   : > { %v570_v9 = vpop.permute.xlu0 %569 }
  0xad   : > { %v565_v11 = vpop.permute.xlu1 %564 }
  0xb0   : > { %v560_v14 = vpop.permute.xlu0 %559 }
  0xb1   : > { %v555_v16 = vpop.permute.xlu1 %554 }
  0xb4   : > { %v550_v23 = vpop.permute.xlu0 %549 }
  0xb5   : > { %v545_v26 = vpop.permute.xlu1 %544 }
  0xe6   : > { %v941_v31 = vpop.f32.mrf.mxu0 }
  0xe7   : > { %v475_v56 = vadd.f32 %v941_v31, %v342_v55  ;;  %v540_v31 = vpop.permute.xlu0 %539 }
  0xe8   : > { %v469_v32 = vpop.f32.mrf.mxu0 }
  0xe9   : > { %v470_v59 = vadd.f32 %v469_v32, %v337_v58  ;;  %v509_v61 = vmax.f32 %v475_v56, 0.0 }
  0xea   : > { %v944_v34 = vpop.f32.mrf.mxu0 }
  0xeb   : > { %v485_v51 = vadd.f32 %v944_v34, %v352_v47  ;;  %v508_v62 = vmax.f32 %v470_v59, 0.0  ;;  %v535_v34 = vpop.permute.xlu1 %534 }
  0xec   : > { %v479_v36 = vpop.f32.mrf.mxu0 }
  0xed   : > { %v480_v53 = vadd.f32 %v479_v36, %v347_v50  ;;  %v511_v57 = vmax.f32 %v485_v51, 0.0 }
  0xee   : > { %v947_v37 = vpop.f32.mrf.mxu0 }
  0xef   : > { %v495_v44 = vadd.f32 %v947_v37, %v362_v35  ;;  %v510_v60 = vmax.f32 %v480_v53, 0.0 }
  0xf0   : > { %v489_v39 = vpop.f32.mrf.mxu0 }
  0xf1   : > { %v490_v48 = vadd.f32 %v489_v39, %v357_v40  ;;  %v513_v52 = vmax.f32 %v495_v44, 0.0  ;;  %v710_v39 = vld [vmem:[%s1375_s5] sm:$0x1f]  ;;  %v715_v40 = vpop.permute.xlu0 %714 }
  0xf2   : > { %v950_v41 = vpop.f32.mrf.mxu0 }
  0xf3   : > { %v505_v42 = vadd.f32 %v950_v41, %v372_v33  ;;  %v512_v54 = vmax.f32 %v490_v48, 0.0 }
  0xf4   : > { %v499_v43 = vpop.f32.mrf.mxu0 }
  0xf5   : > { %v515_v45 = vmax.f32 %v505_v42, 0.0  ;;  %v500_v46 = vadd.f32 %v499_v43, %v367_v38 }
  0xf7   : > { %v514_v49 = vmax.f32 %v500_v46, 0.0  ;;  %951 = vmatprep.subr.mxu1 %v515_v45 }
  0xf8   : > { %952 = vmatpush3.msra.mxu1 %v515_v45 }
  0xf9   : > { %953 = vmatprep.subr.mxu1 %v514_v49 }
  0xfa   : > { %954 = vmatpush3.msra.mxu1 %v514_v49 }
  0xfb   : > { %955 = vmatprep.subr.mxu1 %v513_v52 }
  0xfc   : > { %956 = vmatpush3.msra.mxu1 %v513_v52 }
  0xfd   : > { %957 = vmatprep.subr.mxu1 %v512_v54 }
  0xfe   : > { %958 = vmatpush3.msra.mxu1 %v512_v54 }
  0xff   : > { %959 = vmatprep.subr.mxu1 %v511_v57 }
 0x100   : > { %960 = vmatpush3.msra.mxu1 %v511_v57 }
 0x101   : > { %961 = vmatprep.subr.mxu1 %v510_v60 }
 0x102   : > { %962 = vmatpush3.msra.mxu1 %v510_v60 }
 0x103   : > { %963 = vmatprep.subr.mxu1 %v509_v61 }
 0x104   : > { %964 = vmatpush3.msra.mxu1 %v509_v61 }
 0x105   : > { %965 = vmatprep.subr.mxu1 %v508_v62 }
 0x106   : > { %966 = vmatpush3.msra.mxu1 %v508_v62 }
 0x107   : > { %968 = vmatmul.mubr.msk.f32.vlgmr.msra.gmra.mxu1 %vm572_vm2, %v517_v63 }
 0x108   : > { %970 = vmatprep.mubr.msk.f32.mxu1 %vm572_vm2, %v518_v0 }
 0x10b   : > { %971 = vmatmul.mubr.msk.f32.gmra.mxu1 %vm572_vm2, %v519_v1 }
 0x10c   : > { %973 = vmatprep.mubr.msk.f32.mxu1 %vm572_vm2, %v520_v2 }
 0x10f   : > { %974 = vmatmul.mubr.msk.f32.gmra.mxu1 %vm572_vm2, %v521_v3 }
 0x110   : > { %976 = vmatprep.mubr.msk.f32.mxu1 %vm572_vm2, %v522_v4 }
 0x113   : > { %977 = vmatmul.mubr.msk.f32.gmra.mxu1 %vm572_vm2, %v523_v5 }
 0x1c7   : > { %v969_v7 = vpop.f32.mrf.mxu1 }
 0x1c8   : > { %v669_v32 = vadd.f32 %v969_v7, %v540_v31 }
 0x1c9   : > { %v663_v8 = vpop.f32.mrf.mxu1 }
 0x1ca   : > { %v664_v35 = vadd.f32 %v663_v8, %v535_v34  ;;  %v703_v37 = vmax.f32 %v669_v32, 0.0 }
 0x1cb   : > { %v972_v10 = vpop.f32.mrf.mxu1 }
 0x1cc   : > { %v679_v27 = vadd.f32 %v972_v10, %v550_v23  ;;  %v702_v38 = vmax.f32 %v664_v35, 0.0 }
 0x1cd   : > { %v673_v12 = vpop.f32.mrf.mxu1 }
 0x1ce   : > { %v674_v29 = vadd.f32 %v673_v12, %v545_v26  ;;  %v705_v33 = vmax.f32 %v679_v27, 0.0 }
 0x1cf   : > { %v975_v13 = vpop.f32.mrf.mxu1 }
 0x1d0   : > { %v689_v20 = vadd.f32 %v975_v13, %v560_v14  ;;  %v704_v36 = vmax.f32 %v674_v29, 0.0 }
 0x1d1   : > { %v683_v15 = vpop.f32.mrf.mxu1 }
 0x1d2   : > { %v684_v24 = vadd.f32 %v683_v15, %v555_v16  ;;  %v707_v28 = vmax.f32 %v689_v20, 0.0 }
 0x1d3   : > { %v978_v17 = vpop.f32.mrf.mxu1 }
 0x1d4   : > { %v699_v18 = vadd.f32 %v978_v17, %v570_v9  ;;  %v706_v30 = vmax.f32 %v684_v24, 0.0 }
 0x1d5   : > { %v693_v19 = vpop.f32.mrf.mxu1 }
 0x1d6   : > { %v709_v21 = vmax.f32 %v699_v18, 0.0  ;;  %v694_v22 = vadd.f32 %v693_v19, %v565_v11 }
 0x1d8   : > { %v708_v25 = vmax.f32 %v694_v22, 0.0  ;;  %980 = vmatpush3.msra.mxu0 %v709_v21 }
 0x1d9   : > { %981 = vmatprep.subr.mxu0 %v1105_v6 }
 0x1da   : > { %982 = vmatpush3.msra.mxu0 %v708_v25 }
 0x1db   : > { %983 = vmatprep.subr.mxu0 %v1105_v6 }
 0x1dc   : > { %984 = vmatpush3.msra.mxu0 %v707_v28 }
 0x1dd   : > { %985 = vmatprep.subr.mxu0 %v1105_v6 }
 0x1de   : > { %986 = vmatpush3.msra.mxu0 %v706_v30 }
 0x1df   : > { %987 = vmatprep.subr.mxu0 %v1105_v6 }
 0x1e0   : > { %988 = vmatpush3.msra.mxu0 %v705_v33 }
 0x1e1   : > { %989 = vmatprep.subr.mxu0 %v1105_v6 }
 0x1e2   : > { %990 = vmatpush3.msra.mxu0 %v704_v36 }
 0x1e3   : > { %991 = vmatprep.subr.mxu0 %v1105_v6 }
 0x1e4   : > { %992 = vmatpush3.msra.mxu0 %v703_v37 }
 0x1e5   : > { %993 = vmatprep.subr.mxu0 %v1105_v6 }
 0x1e6   : > { %994 = vmatpush3.msra.mxu0 %v702_v38 }
 0x1e7   : > { %996 = vmatmul.mubr.msk.f32.vlgmr.msra.gmra.mxu0 %vm572_vm2, %v710_v39 }
 0x2a7   : > { %v786_v41 = vpop.f32.mrf.mxu0 }
 0x2a8   : > { %v787_v42 = vadd.f32 %v786_v41, %v715_v40 }
 0x2a9   : > { %v997_v43 = vpop.f32.mrf.mxu0 }
 0x2aa   : > { %790 = vst [vmem:[%s315_s14] sm:$0x1f] %v787_v42 }
 0x2ab   : > { %1055 = shalt.err (!%p1052_p5)
}
 0x2ac   : > { %s1056_s29 = scalar_lea.hbm %s1333_s18, 128  ;;  %s1060_s9 = scalar_lea.hbm %s1377_s7, 256 }
 0x2ad   : > { %p1057_p7 = scmp.ne.s32.totalorder %s1333_s18, %s1056_s29  ;;  %p1061_p12 = scmp.lt.s32.totalorder %s1333_s18, %s1377_s7 }
 0x2ae   : > { %p1062_p13 = scmp.lt.s32.totalorder %s1060_s9, %s1056_s29 }
 0x2af   : > { %p1058_p10 = pnand %p1057_p7, %p1186_p6 }
 0x2b0   : > { %p1063_p0 = por %p1062_p13, %p1061_p12 }
 0x2b1   : > { %p1059_p11 = pneg %p1058_p10 }
 0x2b3   : > { %p1064_p1 = pnand %p1063_p0, %p1059_p11 }
 0x2b5   : > { %1067 = shalt.err (!%p1064_p1)
}
 0x2b6   : > { %998 = dma.vmem_to_hbm [thread:$0]  (%p1186_p6), %s806_s15, 128, %s1333_s18, %s792_s19  }
 0x2b7 PF: > { %s817_s16 = sand.u32 1, %s1090_s24   ;;  %p1001_p2 = pnand %p872_p9, %p1190_p8 }
 0x2b8   : > { %s818_s17 = scalar_lea.sflag [#allocation4], %s817_s16 }
 0x2b9   : > { %p1002_p3 = pneg %p1001_p2 }
 0x2bb   : > { %1085 = dma.done.wait (%p1002_p3), %s818_s17, 128  }
 0x2bc   : > { %1087 = vsyncadd (%p1002_p3), %s818_s17, 4294967168  ;;  %p17_p4 = scmp.ge.s32.totalorder %s1171_s30, 4   ;;  %s1380_s24 = smov %s1094_s25 }
 0x2bd   : > { %s1381_s25 = smov %s1098_s26  ;;  %s1382_s26 = smov %s1184_s10 }
 0x2be   : > { %s1383_s27 = smov %s1171_s30  ;;  %19 = sbr.rel (!%p17_p4) target bundleno = 3 (0x3), region = 126 }
 0x2c3   :  { %823 = vsyncpa [#allocation4], 1 }
 0x2c4   :  { %825 = vsyncpa [#allocation4 + $0x1], 1 }

</bundles_post_ra>
